<compile_context>
chip_gen: v5e
topology: v5e:2x2
jax: 0.10.0
libtpu: 0.0.40
codegen_flags: <defaults>
</compile_context>

<pallas_src>
import jax
import jax.numpy as jnp
import numpy as np
from jax.experimental import pallas as pl
from jax.experimental.pallas import tpu as pltpu


def _normalize_kernel(scale_ref, bias_ref, x_ref, o_ref):
    # scale/bias: (TR, 1) f32, broadcast along lanes. x/o: (TR, TC).
    x = x_ref[...].astype(jnp.float32)
    o_ref[...] = (x * scale_ref[...] + bias_ref[...]).astype(o_ref.dtype)


def _choose_tile(dim, base, max_tile):
    """Largest multiple of `base` that divides `dim` and is <= max_tile.

    Falls back to the full dimension (full-dim exception to the (8,128) rule)
    when `dim` is not a multiple of `base`.
    """
    if dim <= 0 or dim % base != 0:
        return dim
    best = base
    for t in range(base, min(dim, max_tile) + 1, base):
        if dim % t == 0:
            best = t
    return best


def normalize(x, mean, std):
    """Pallas equivalent of Normalize.forward for NCHW input `x`.

    mean, std: scalars or 1-D arrays of length C (per-channel), matching the
    PyTorch `mean.view(-1, 1, 1)` broadcast convention.
    """
    N, C, H, W = x.shape
    rows = N * C
    cols = H * W

    # Fold (x - mean) / std  ->  x * inv_std + (-mean * inv_std), in f32.
    mean_f32 = jnp.broadcast_to(jnp.asarray(mean, jnp.float32).reshape(-1), (C,))
    std_f32 = jnp.broadcast_to(jnp.asarray(std, jnp.float32).reshape(-1), (C,))
    inv_std = 1.0 / std_f32
    # Row r of the (N*C, H*W) view belongs to channel r % C.
    scale = jnp.tile(inv_std, N).reshape(rows, 1)                 # (N*C, 1)
    bias = jnp.tile(-mean_f32 * inv_std, N).reshape(rows, 1)      # (N*C, 1)

    # Contiguous lane-dense 2D view of the NCHW tensor (free reshape).
    x2 = x.reshape(rows, cols)

    # Tile sizes: sublane dim in multiples of 8, lane dim in multiples of 128,
    # ~1 MiB f32 per buffer max -> in+out double-buffering stays well under the
    # scoped VMEM limit on v5e (16 MiB), v6e (32 MiB) and v7x (32/64 MiB).
    tr = _choose_tile(rows, 8, 256)
    tc = _choose_tile(cols, 128, 1024)
    grid = (rows // tr, cols // tc)

    out2 = pl.pallas_call(
        _normalize_kernel,
        out_shape=jax.ShapeDtypeStruct((rows, cols), x.dtype),
        grid=grid,
        in_specs=[
            pl.BlockSpec((tr, 1), lambda i, j: (i, 0)),   # per-row scale
            pl.BlockSpec((tr, 1), lambda i, j: (i, 0)),   # per-row bias
            pl.BlockSpec((tr, tc), lambda i, j: (i, j)),  # x tile
        ],
        out_specs=pl.BlockSpec((tr, tc), lambda i, j: (i, j)),
        compiler_params=pltpu.CompilerParams(
            dimension_semantics=("parallel", "parallel")),
    )(scale, bias, x2)

    return out2.reshape(N, C, H, W)


if __name__ == "__main__":
    key = jax.random.PRNGKey(0)
    N, C, H, W = 2, 4, 16, 16
    x = jax.random.normal(key, (N, C, H, W), dtype=jnp.float32)

    # Deterministic per-channel "parameters", as supplied in __init__.
    mean = jnp.array([0.485, 0.456, 0.406, 0.5], dtype=jnp.float32)
    std = jnp.array([0.229, 0.224, 0.225, 0.25], dtype=jnp.float32)

    out = normalize(x, mean, std)
    out = jax.block_until_ready(out)

    # Reference check (plain JAX, mirrors the PyTorch broadcast).
    ref = (x - mean[None, :, None, None]) / std[None, :, None, None]
    np.testing.assert_allclose(np.asarray(out), np.asarray(ref),
                               rtol=1e-6, atol=1e-6)

    print("KERNEL_OK")
</pallas_src>

<mosaic_0001>
module attributes {stable_mosaic.version = 11 : i64} {
  func.func @_normalize_kernel(%arg0: i32, %arg1: i32, %arg2: memref<8x1xf32, #tpu.memory_space<vmem>>, %arg3: memref<8x1xf32, #tpu.memory_space<vmem>>, %arg4: memref<8x256xf32, #tpu.memory_space<vmem>>, %arg5: memref<8x256xf32, #tpu.memory_space<vmem>>) attributes {dimension_semantics = [#tpu.dimension_semantics<parallel>, #tpu.dimension_semantics<parallel>], iteration_bounds = array<i64: 1, 1>, scalar_prefetch = 0 : i64, scratch_operands = 0 : i64, tpu.core_type = #tpu.core_type<tc>, window_params = [{transform_indices = @transform_0, window_bounds = array<i64: 8, 1>}, {transform_indices = @transform_1, window_bounds = array<i64: 8, 1>}, {transform_indices = @transform_2, window_bounds = array<i64: 8, 256>}, {transform_indices = @transform_3, window_bounds = array<i64: 8, 256>}]} {
    %c0 = arith.constant 0 : index
    %c0_0 = arith.constant 0 : index
    %0 = vector.load %arg4[%c0, %c0_0] : memref<8x256xf32, #tpu.memory_space<vmem>>, vector<8x256xf32>
    %c0_1 = arith.constant 0 : index
    %c0_2 = arith.constant 0 : index
    %1 = vector.load %arg2[%c0_1, %c0_2] : memref<8x1xf32, #tpu.memory_space<vmem>>, vector<8x1xf32>
    %2 = vector.broadcast %1 : vector<8x1xf32> to vector<8x256xf32>
    %3 = arith.mulf %0, %2 : vector<8x256xf32>
    %c0_3 = arith.constant 0 : index
    %c0_4 = arith.constant 0 : index
    %4 = vector.load %arg3[%c0_3, %c0_4] : memref<8x1xf32, #tpu.memory_space<vmem>>, vector<8x1xf32>
    %5 = vector.broadcast %4 : vector<8x1xf32> to vector<8x256xf32>
    %6 = arith.addf %3, %5 : vector<8x256xf32>
    %c0_5 = arith.constant 0 : index
    %c0_6 = arith.constant 0 : index
    %7 = vector.load %arg5[%c0_5, %c0_6] : memref<8x256xf32, #tpu.memory_space<vmem>>, vector<8x256xf32>
    tpu.vector_store %arg5[%c0_5, %c0_6], %6 {strides = array<i32>} : memref<8x256xf32, #tpu.memory_space<vmem>>, vector<8x256xf32>,
    return
  }
  func.func @transform_0(%arg0: i32, %arg1: i32) -> (i32, i32) {
    %c0_i32 = arith.constant 0 : i32
    %c0_i32_0 = arith.constant 0 : i32
    return %arg0, %c0_i32 : i32, i32
  }
  func.func @transform_1(%arg0: i32, %arg1: i32) -> (i32, i32) {
    %c0_i32 = arith.constant 0 : i32
    %c0_i32_0 = arith.constant 0 : i32
    return %arg0, %c0_i32 : i32, i32
  }
  func.func @transform_2(%arg0: i32, %arg1: i32) -> (i32, i32) {
    %c0_i32 = arith.constant 0 : i32
    return %arg0, %arg1 : i32, i32
  }
  func.func @transform_3(%arg0: i32, %arg1: i32) -> (i32, i32) {
    %c0_i32 = arith.constant 0 : i32
    return %arg0, %arg1 : i32, i32
  }
}

</mosaic_0001>

<bundles_post_ra>
// kernel: tpu_custom_call.1
= control target key start
LH: loop header
LB: loop body
LE: loop exit
PB: predicated region body
PF: predicated region fallthrough
CT: control target
= control target key end

     0   :  { %s117_s0 = inlined_call_operand.vmem [shape: f32[8,1], index: 0, kind: input, shape index: {}]   ;;  %s118_s1 = inlined_call_operand.vmem [shape: f32[8,1], index: 1, kind: input, shape index: {}]   ;;  %s119_s2 = inlined_call_operand.vmem [shape: f32[8,256], index: 2, kind: input, shape index: {}]   ;;  %s120_s3 = inlined_call_operand.hbm [shape: f32[8,256], index: 3, kind: output, shape index: {}]  }
   0x1   :  { %v17_v0 = vld [vmem:[%s117_s0] sm:$0xff] }
   0x2   :  { %8 = vsyncpa [#allocation3], 0  ;;  %v80_v1 = vmov 0   ;;  %v25_v2 = vld [vmem:[%s118_s1] sm:$0xff]  ;;  %v16_v5 = vld [vmem:[%s119_s2 + $0x8] sm:$0xff]  ;;  %s81_s0 = smov [#allocation2]  }
   0x3   :  { %53 = vset.pattern.permute.xlu0 %v80_v1  ;;  %v15_v4 = vld [vmem:[%s119_s2] sm:$0xff]  ;;  %s40_s20 = sshll.u32 %s81_s0, 4  ;;  %s42_s23 = sshll.u32 %s120_s3, 4  ;;  %s41_s20 = int_to_ptr.vmem [resolvable:$true] %s40_s20  ;;  %s43_s23 = int_to_ptr.hbm [resolvable:$true] %s42_s23 }
   0x4   :  { %20 = vperm.xlu0 %53, %v17_v0  }
   0xc   :  { %28 = vperm.xlu0 %53, %v25_v2  }
  0x76   :  { %v21_v3 = vpop.permute.xlu0 %20 }
  0x77   :  { %v23_v6 = vmul.f32 %v21_v3, %v15_v4  ;;  %v24_v7 = vmul.f32 %v21_v3, %v16_v5 }
  0x7e   :  { %v29_v8 = vpop.permute.xlu0 %28 }
  0x7f   :  { %v31_v9 = vadd.f32 %v29_v8, %v23_v6  ;;  %v32_v10 = vadd.f32 %v29_v8, %v24_v7 }
  0x81   :  { %33 = vst [vmem:[#allocation2] sm:$0xff] %v31_v9 }
  0x82   :  { %34 = vst [vmem:[#allocation2 + $0x8] sm:$0xff] %v32_v10 }
  0x83   :  { %45 = dma.vmem_to_hbm [thread:$0]  %s41_s20, 256, %s43_s23, [#allocation3]  }
  0x84   :  { %78 = dma.done.wait [#allocation3], 256  }
  0x85   :  { %79 = vsyncadd [#allocation3], 4294967040 }
  0x86   :  { %50 = vsyncpa [#allocation3], 1 }

</bundles_post_ra>
